<compile_context>
chip_gen: v5e
topology: v5e:2x2
jax: 0.10.0
libtpu: 0.0.40
codegen_flags: <defaults>
</compile_context>

<pallas_src>
import functools

import jax
import jax.numpy as jnp
from jax.experimental import pallas as pl
from jax.experimental.pallas import tpu as pltpu

LANE = 128       # lane width: feature dims padded to a multiple of this
SUBLANE = 8      # sublane alignment for the row dimension
ROW_TILE = 512   # max rows per grid step (fits easily in VMEM at F=128, f32)


def _round_up(x, m):
    return (x + m - 1) // m * m


# ---------------------------------------------------------------------------
# Fused kernel: all L layers of (x @ W + b) -> ReLU, activation kept on-chip.
# ---------------------------------------------------------------------------
def _fused_blocklist_kernel(x_ref, w_ref, b_ref, o_ref, *, num_layers):
    # x_ref: (TR, F) f32     row tile of activations (lane-dense, padded)
    # w_ref: (L, F, F) bf16  pre-transposed, zero-padded, VMEM-resident
    # b_ref: (L, 1, F) f32   zero-padded biases
    # o_ref: (TR, F) f32
    h = x_ref[...]
    for l in range(num_layers):  # static, unrolled (L is small)
        y = jnp.dot(h.astype(jnp.bfloat16), w_ref[l],
                    preferred_element_type=jnp.float32)   # MXU, f32 accumulate
        y = y + b_ref[l]                                   # f32 epilogue
        h = jnp.maximum(y, 0.0)                            # ReLU; dropout == id (eval)
    o_ref[...] = h.astype(o_ref.dtype)


# ---------------------------------------------------------------------------
# Parameter construction / packing (all layout work hoisted out of forward).
# ---------------------------------------------------------------------------
def init_block_params(key, in_size, out_size):
    """Deterministic init mimicking nn.Linear's uniform(-1/sqrt(in), 1/sqrt(in))."""
    kw, kb = jax.random.split(key)
    bound = 1.0 / jnp.sqrt(jnp.float32(in_size))
    w = jax.random.uniform(kw, (out_size, in_size), jnp.float32, -bound, bound)
    b = jax.random.uniform(kb, (out_size,), jnp.float32, -bound, bound)
    return w, b


def blocklist_sizes(count, in_size, hid_size1, out_size):
    """Replicates BlockList.__init__ sizing logic."""
    if count == 0:
        return []
    if count == 1:
        return [(in_size, out_size)]
    return ([(in_size, hid_size1)]
            + [(hid_size1, hid_size1)] * (count - 2)
            + [(hid_size1, out_size)])


def init_blocklist_params(key, count, in_size, hid_size1, out_size):
    sizes = blocklist_sizes(count, in_size, hid_size1, out_size)
    return [init_block_params(jax.random.fold_in(key, i), n_in, n_out)
            for i, (n_in, n_out) in enumerate(sizes)]


def pack_blocklist_params(raw_params):
    """One-time packing: transpose to (in, out), zero-pad features to a
    lane-dense multiple of 128, stack all layers, cast weights to bf16."""
    if not raw_params:
        return None
    feat_max = max(max(w.shape) for (w, _) in raw_params)
    F = _round_up(feat_max, LANE)
    L = len(raw_params)
    w_stack = jnp.zeros((L, F, F), jnp.float32)
    b_stack = jnp.zeros((L, 1, F), jnp.float32)
    for l, (w, b) in enumerate(raw_params):
        out_size, in_size = w.shape
        w_stack = w_stack.at[l, :in_size, :out_size].set(w.T)
        b_stack = b_stack.at[l, 0, :out_size].set(b)
    return {
        "w": w_stack.astype(jnp.bfloat16),   # (L, F, F) bf16
        "b": b_stack,                        # (L, 1, F) f32
        "feat_pad": F,
        "in_size": raw_params[0][0].shape[1],
        "out_size": raw_params[-1][0].shape[0],
        "num_layers": L,
    }


# ---------------------------------------------------------------------------
# Forward wrapper.
# ---------------------------------------------------------------------------
def blocklist_forward(x, packed, *, row_tile=ROW_TILE):
    """BlockList.forward: x (..., in_size) -> (..., out_size)."""
    if packed is None:  # count == 0 -> identity (empty ModuleList)
        return x

    F = packed["feat_pad"]
    L = packed["num_layers"]
    out_size = packed["out_size"]

    lead = x.shape[:-1]
    in_size = x.shape[-1]
    h = x.reshape(-1, in_size)
    rows = h.shape[0]

    tr = min(row_tile, _round_up(rows, SUBLANE))
    rows_pad = _round_up(rows, tr)
    # Lane-dense, sublane-aligned activation slab. Zero padding is preserved
    # exactly by the zero-padded weights/biases.
    h = jnp.pad(h, ((0, rows_pad - rows), (0, F - in_size)))

    kernel = functools.partial(_fused_blocklist_kernel, num_layers=L)
    y = pl.pallas_call(
        kernel,
        out_shape=jax.ShapeDtypeStruct((rows_pad, F), jnp.float32),
        grid_spec=pltpu.PrefetchScalarGridSpec(
            num_scalar_prefetch=0,
            grid=(rows_pad // tr,),
            in_specs=[
                pl.BlockSpec((tr, F), lambda i: (i, 0)),       # row-tiled acts
                pl.BlockSpec((L, F, F), lambda i: (0, 0, 0)),  # weights, VMEM-resident
                pl.BlockSpec((L, 1, F), lambda i: (0, 0, 0)),  # biases, VMEM-resident
            ],
            out_specs=pl.BlockSpec((tr, F), lambda i: (i, 0)),
        ),
        compiler_params=pltpu.CompilerParams(
            # Row axis is independent -> megacore-shards across v7x's 2 TCs.
            dimension_semantics=("parallel",),
            # Explicit budget that fits every generation (v7x physical = 64 MiB).
            vmem_limit_bytes=32 * 1024 * 1024,
        ),
    )(h, packed["w"], packed["b"])

    return y[:rows, :out_size].reshape(*lead, out_size)


# ---------------------------------------------------------------------------
# Demo + reference check.
# ---------------------------------------------------------------------------
if __name__ == "__main__":
    key = jax.random.PRNGKey(0)

    # Small, module-consistent shapes: count=3 blocks, in=32, hid=64, out=48.
    count, in_size, hid_size1, out_size = 3, 32, 64, 48
    batch, seq = 2, 8

    kx, kp = jax.random.split(key)
    x = jax.random.normal(kx, (batch, seq, in_size), dtype=jnp.float32)

    raw_params = init_blocklist_params(kp, count, in_size, hid_size1, out_size)
    packed = pack_blocklist_params(raw_params)

    fwd = jax.jit(lambda xx: blocklist_forward(xx, packed))
    y = jax.block_until_ready(fwd(x))

    # Precision-matched reference in plain JAX (bf16 matmul operands, f32
    # accumulation, f32 epilogue; eval-mode dropout == identity).
    h = x.reshape(-1, in_size)
    for (w, b) in raw_params:
        z = jnp.dot(h.astype(jnp.bfloat16), w.T.astype(jnp.bfloat16),
                    preferred_element_type=jnp.float32) + b
        h = jnp.maximum(z, 0.0)
    ref = h.reshape(batch, seq, out_size)

    assert y.shape == (batch, seq, out_size)
    assert jnp.allclose(y, ref, atol=2e-3, rtol=2e-3)

    print("KERNEL_OK")
</pallas_src>

<mosaic_0001>
module attributes {stable_mosaic.version = 11 : i64} {
  func.func @_fused_blocklist_kernel(%arg0: i32, %arg1: memref<16x128xf32, #tpu.memory_space<vmem>>, %arg2: memref<3x128x128xbf16, #tpu.memory_space<vmem>>, %arg3: memref<3x1x128xf32, #tpu.memory_space<vmem>>, %arg4: memref<16x128xf32, #tpu.memory_space<vmem>>) attributes {dimension_semantics = [#tpu.dimension_semantics<parallel>], iteration_bounds = array<i64: 1>, scalar_prefetch = 0 : i64, scratch_operands = 0 : i64, tpu.core_type = #tpu.core_type<tc>, window_params = [{transform_indices = @transform_0, window_bounds = array<i64: 16, 128>}, {pipeline_mode = #tpu.pipeline_mode<synchronous>, transform_indices = @transform_1, window_bounds = array<i64: 3, 128, 128>}, {pipeline_mode = #tpu.pipeline_mode<synchronous>, transform_indices = @transform_2, window_bounds = array<i64: 3, 1, 128>}, {transform_indices = @transform_3, window_bounds = array<i64: 16, 128>}]} {
    %c0 = arith.constant 0 : index
    %c0_0 = arith.constant 0 : index
    %0 = vector.load %arg1[%c0, %c0_0] : memref<16x128xf32, #tpu.memory_space<vmem>>, vector<16x128xf32>
    %1 = arith.truncf %0 : vector<16x128xf32> to vector<16x128xbf16>
    %c0_1 = arith.constant 0 : index
    %c0_2 = arith.constant 0 : index
    %c0_3 = arith.constant 0 : index
    %2 = vector.load %arg2[%c0_1, %c0_2, %c0_3] : memref<3x128x128xbf16, #tpu.memory_space<vmem>>, vector<1x128x128xbf16>
    %3 = vector.shape_cast %2 : vector<1x128x128xbf16> to vector<128x128xbf16>
    %cst = arith.constant dense<0.000000e+00> : vector<16x128xf32>
    %4 = tpu.matmul %1, %3, %cst {dimension_numbers = #tpu.dot_dimension_numbers<[1], [0], [0], [1], [0, 0, 1, 1], [], []>} : vector<16x128xbf16>, vector<128x128xbf16>, vector<16x128xf32> -> vector<16x128xf32>
    %c0_4 = arith.constant 0 : index
    %c0_5 = arith.constant 0 : index
    %c0_6 = arith.constant 0 : index
    %5 = vector.load %arg3[%c0_4, %c0_5, %c0_6] : memref<3x1x128xf32, #tpu.memory_space<vmem>>, vector<1x1x128xf32>
    %6 = vector.shape_cast %5 : vector<1x1x128xf32> to vector<1x128xf32>
    %7 = vector.broadcast %6 : vector<1x128xf32> to vector<16x128xf32>
    %8 = arith.addf %4, %7 : vector<16x128xf32>
    %cst_7 = arith.constant 0.000000e+00 : f32
    %9 = vector.broadcast %cst_7 : f32 to vector<16x128xf32>
    %10 = arith.maximumf %8, %9 : vector<16x128xf32>
    %11 = arith.truncf %10 : vector<16x128xf32> to vector<16x128xbf16>
    %c1 = arith.constant 1 : index
    %c0_8 = arith.constant 0 : index
    %c0_9 = arith.constant 0 : index
    %12 = vector.load %arg2[%c1, %c0_8, %c0_9] : memref<3x128x128xbf16, #tpu.memory_space<vmem>>, vector<1x128x128xbf16>
    %13 = vector.shape_cast %12 : vector<1x128x128xbf16> to vector<128x128xbf16>
    %cst_10 = arith.constant dense<0.000000e+00> : vector<16x128xf32>
    %14 = tpu.matmul %11, %13, %cst_10 {dimension_numbers = #tpu.dot_dimension_numbers<[1], [0], [0], [1], [0, 0, 1, 1], [], []>} : vector<16x128xbf16>, vector<128x128xbf16>, vector<16x128xf32> -> vector<16x128xf32>
    %c1_11 = arith.constant 1 : index
    %c0_12 = arith.constant 0 : index
    %c0_13 = arith.constant 0 : index
    %15 = vector.load %arg3[%c1_11, %c0_12, %c0_13] : memref<3x1x128xf32, #tpu.memory_space<vmem>>, vector<1x1x128xf32>
    %16 = vector.shape_cast %15 : vector<1x1x128xf32> to vector<1x128xf32>
    %17 = vector.broadcast %16 : vector<1x128xf32> to vector<16x128xf32>
    %18 = arith.addf %14, %17 : vector<16x128xf32>
    %cst_14 = arith.constant 0.000000e+00 : f32
    %19 = vector.broadcast %cst_14 : f32 to vector<16x128xf32>
    %20 = arith.maximumf %18, %19 : vector<16x128xf32>
    %21 = arith.truncf %20 : vector<16x128xf32> to vector<16x128xbf16>
    %c2 = arith.constant 2 : index
    %c0_15 = arith.constant 0 : index
    %c0_16 = arith.constant 0 : index
    %22 = vector.load %arg2[%c2, %c0_15, %c0_16] : memref<3x128x128xbf16, #tpu.memory_space<vmem>>, vector<1x128x128xbf16>
    %23 = vector.shape_cast %22 : vector<1x128x128xbf16> to vector<128x128xbf16>
    %cst_17 = arith.constant dense<0.000000e+00> : vector<16x128xf32>
    %24 = tpu.matmul %21, %23, %cst_17 {dimension_numbers = #tpu.dot_dimension_numbers<[1], [0], [0], [1], [0, 0, 1, 1], [], []>} : vector<16x128xbf16>, vector<128x128xbf16>, vector<16x128xf32> -> vector<16x128xf32>
    %c2_18 = arith.constant 2 : index
    %c0_19 = arith.constant 0 : index
    %c0_20 = arith.constant 0 : index
    %25 = vector.load %arg3[%c2_18, %c0_19, %c0_20] : memref<3x1x128xf32, #tpu.memory_space<vmem>>, vector<1x1x128xf32>
    %26 = vector.shape_cast %25 : vector<1x1x128xf32> to vector<1x128xf32>
    %27 = vector.broadcast %26 : vector<1x128xf32> to vector<16x128xf32>
    %28 = arith.addf %24, %27 : vector<16x128xf32>
    %cst_21 = arith.constant 0.000000e+00 : f32
    %29 = vector.broadcast %cst_21 : f32 to vector<16x128xf32>
    %30 = arith.maximumf %28, %29 : vector<16x128xf32>
    %c0_22 = arith.constant 0 : index
    %c0_23 = arith.constant 0 : index
    %31 = vector.load %arg4[%c0_22, %c0_23] : memref<16x128xf32, #tpu.memory_space<vmem>>, vector<16x128xf32>
    tpu.vector_store %arg4[%c0_22, %c0_23], %30 {strides = array<i32>} : memref<16x128xf32, #tpu.memory_space<vmem>>, vector<16x128xf32>,
    return
  }
  func.func @transform_0(%arg0: i32) -> (i32, i32) {
    %c0_i32 = arith.constant 0 : i32
    %c0_i32_0 = arith.constant 0 : i32
    return %arg0, %c0_i32 : i32, i32
  }
  func.func @transform_1(%arg0: i32) -> (i32, i32, i32) {
    %c0_i32 = arith.constant 0 : i32
    %c0_i32_0 = arith.constant 0 : i32
    %c0_i32_1 = arith.constant 0 : i32
    %c0_i32_2 = arith.constant 0 : i32
    return %c0_i32, %c0_i32_0, %c0_i32_1 : i32, i32, i32
  }
  func.func @transform_2(%arg0: i32) -> (i32, i32, i32) {
    %c0_i32 = arith.constant 0 : i32
    %c0_i32_0 = arith.constant 0 : i32
    %c0_i32_1 = arith.constant 0 : i32
    %c0_i32_2 = arith.constant 0 : i32
    return %c0_i32, %c0_i32_0, %c0_i32_1 : i32, i32, i32
  }
  func.func @transform_3(%arg0: i32) -> (i32, i32) {
    %c0_i32 = arith.constant 0 : i32
    %c0_i32_0 = arith.constant 0 : i32
    return %arg0, %c0_i32 : i32, i32
  }
}

</mosaic_0001>

<bundles_post_ra>
// kernel: _lambda_.1
= control target key start
LH: loop header
LB: loop body
LE: loop exit
PB: predicated region body
PF: predicated region fallthrough
CT: control target
= control target key end

     0   :  { %8 = vsyncpa [#allocation3], 0  ;;  %s452_s15 = smov [#allocation2]   ;;  %s453_s17 = smov 64   ;;  %s499_s0 = inlined_call_operand.vmem [shape: f32[16,128], index: 0, kind: input, shape index: {}]   ;;  %s500_s1 = inlined_call_operand.hbm [shape: bf16[3,128,128], index: 1, kind: input, shape index: {}]   ;;  %s501_s2 = inlined_call_operand.vmem [shape: f32[3,1,128], index: 2, kind: input, shape index: {}]   ;;  %s502_s3 = inlined_call_operand.vmem [shape: f32[16,128], index: 3, kind: output, shape index: {}]  }
   0x1   :  { %s15_s14 = sshll.u32 %s500_s1, 4  ;;  %s17_s16 = sshll.u32 %s452_s15, 4  ;;  %s16_s14 = int_to_ptr.hbm [resolvable:$true] %s15_s14  ;;  %s18_s16 = int_to_ptr.vmem [resolvable:$true] %s17_s16 }
   0x2   :  { %s454_s18 = smov 4  }
   0x3   :  { %23 = dma.hbm_to_vmem [thread:$0]  %s16_s14, 3072, %s18_s16, [#allocation3], %s453_s17, %s453_s17, %s454_s18  }
   0x4   :  { %450 = dma.done.wait [#allocation3], 3072  }
   0x5   :  { %451 = vsyncadd [#allocation3], 4294964224  ;;  %v403_v0 = vld [vmem:[#allocation2 + $0x38] sm:$0xff]  ;;  %v402_v1 = vld [vmem:[#allocation2 + $0x30] sm:$0xff] }
   0x6   :  { %101 = vmatpush.bf16.msra.mxu0 %v403_v0  ;;  %v411_v2 = vld [vmem:[#allocation2 + $0x78] sm:$0xff]  ;;  %v410_v3 = vld [vmem:[#allocation2 + $0x70] sm:$0xff]  ;;  %v401_v4 = vld [vmem:[#allocation2 + $0x28] sm:$0xff] }
   0x7   :  { %188 = vmatpush.bf16.msra.mxu1 %v411_v2  ;;  %v409_v5 = vld [vmem:[#allocation2 + $0x68] sm:$0xff]  ;;  %v400_v6 = vld [vmem:[#allocation2 + $0x20] sm:$0xff]  ;;  %v399_v8 = vld [vmem:[#allocation2 + $0x18] sm:$0xff] }
   0x8   :  { %v408_v7 = vld [vmem:[#allocation2 + $0x60] sm:$0xff]  ;;  %v398_v9 = vld [vmem:[#allocation2 + $0x10] sm:$0xff]  ;;  %v397_v10 = vld [vmem:[#allocation2 + $0x8] sm:$0xff] }
   0x9   :  { %v396_v11 = vld [vmem:[#allocation2] sm:$0xff]  ;;  %v31_v13 = vld [vmem:[%s499_s0 + $0x8] sm:$0xff]  ;;  %v407_v15 = vld [vmem:[#allocation2 + $0x58] sm:$0xff] }
   0xa   :  { %102 = vmatpush.bf16.msra.mxu0 %v402_v1  ;;  %v30_v12 = vld [vmem:[%s499_s0] sm:$0xff]  ;;  %v406_v16 = vld [vmem:[#allocation2 + $0x50] sm:$0xff]  ;;  %v405_v17 = vld [vmem:[#allocation2 + $0x48] sm:$0xff] }
   0xb   :  { %189 = vmatpush.bf16.msra.mxu1 %v410_v3  ;;  %v32_v14 = vpack.c.bf16 %v31_v13, %v30_v12  ;;  %v404_v18 = vld [vmem:[#allocation2 + $0x40] sm:$0xff]  ;;  %v419_v19 = vld [vmem:[#allocation2 + $0xb8] sm:$0xff]  ;;  %v418_v20 = vld [vmem:[#allocation2 + $0xb0] sm:$0xff] }
   0xc   :  { %275 = vmatpush.bf16.msra.mxu2 %v419_v19  ;;  %v417_v21 = vld [vmem:[#allocation2 + $0xa8] sm:$0xff]  ;;  %v416_v22 = vld [vmem:[#allocation2 + $0xa0] sm:$0xff]  ;;  %v415_v31 = vld [vmem:[#allocation2 + $0x98] sm:$0xff] }
   0xd   :  { %v423_v24 = vld [vmem:[%s501_s2] ss:$0 sm:$0xff]  ;;  %v414_v32 = vld [vmem:[#allocation2 + $0x90] sm:$0xff]  ;;  %v413_v33 = vld [vmem:[#allocation2 + $0x88] sm:$0xff] }
   0xe   :  { %103 = vmatpush.bf16.msra.mxu0 %v401_v4  ;;  %v412_v34 = vld [vmem:[#allocation2 + $0x80] sm:$0xff] }
   0xf   :  { %190 = vmatpush.bf16.msra.mxu1 %v409_v5  ;;  %v424_v36 = vld [vmem:[%s501_s2 + $0x1] ss:$0 sm:$0xff]  ;;  %v425_v43 = vld [vmem:[%s501_s2 + $0x2] ss:$0 sm:$0xff] }
  0x10   :  { %276 = vmatpush.bf16.msra.mxu2 %v418_v20 }
  0x12   :  { %104 = vmatpush.bf16.msra.mxu0 %v400_v6 }
  0x13   :  { %191 = vmatpush.bf16.msra.mxu1 %v408_v7 }
  0x14   :  { %277 = vmatpush.bf16.msra.mxu2 %v417_v21 }
  0x16   :  { %105 = vmatpush.bf16.msra.mxu0 %v399_v8 }
  0x17   :  { %192 = vmatpush.bf16.msra.mxu1 %v407_v15 }
  0x18   :  { %278 = vmatpush.bf16.msra.mxu2 %v416_v22 }
  0x1a   :  { %106 = vmatpush.bf16.msra.mxu0 %v398_v9 }
  0x1b   :  { %193 = vmatpush.bf16.msra.mxu1 %v406_v16 }
  0x1c   :  { %279 = vmatpush.bf16.msra.mxu2 %v415_v31 }
  0x1e   :  { %107 = vmatpush.bf16.msra.mxu0 %v397_v10 }
  0x1f   :  { %194 = vmatpush.bf16.msra.mxu1 %v405_v17 }
  0x20   :  { %280 = vmatpush.bf16.msra.mxu2 %v414_v32 }
  0x22   :  { %108 = vmatpush.bf16.msra.mxu0 %v396_v11 }
  0x23   :  { %195 = vmatpush.bf16.msra.mxu1 %v404_v18 }
  0x24   :  { %281 = vmatpush.bf16.msra.mxu2 %v413_v33 }
  0x25   :  { %109 = vmatmul.bf16.vlgmr.msra.gmra.mxu0 %v32_v14 }
  0x28   :  { %282 = vmatpush.bf16.msra.mxu2 %v412_v34 }
  0xa2   :  { %v110_v23 = vpop.f32.mrf.mxu0 }
  0xa3   :  { %v111_v25 = vadd.f32 %v423_v24, %v110_v23 }
  0xa5   :  { %v115_v28 = vmax.f32 %v111_v25, 0.0 }
  0xaa   :  { %v112_v26 = vpop.f32.mrf.mxu0 }
  0xab   :  { %v113_v27 = vadd.f32 %v423_v24, %v112_v26 }
  0xad   :  { %v116_v29 = vmax.f32 %v113_v27, 0.0 }
  0xaf   :  { %v117_v30 = vpack.c.bf16 %v116_v29, %v115_v28 }
  0xb1   :  { %196 = vmatmul.bf16.vlgmr.msra.gmra.mxu1 %v117_v30 }
 0x12e   :  { %v197_v35 = vpop.f32.mrf.mxu1 }
 0x12f   :  { %v198_v37 = vadd.f32 %v424_v36, %v197_v35 }
 0x131   :  { %v202_v40 = vmax.f32 %v198_v37, 0.0 }
 0x136   :  { %v199_v38 = vpop.f32.mrf.mxu1 }
 0x137   :  { %v200_v39 = vadd.f32 %v424_v36, %v199_v38 }
 0x139   :  { %v203_v41 = vmax.f32 %v200_v39, 0.0 }
 0x13b   :  { %v204_v42 = vpack.c.bf16 %v203_v41, %v202_v40 }
 0x13d   :  { %283 = vmatmul.bf16.vlgmr.msra.gmra.mxu2 %v204_v42 }
 0x1c0   :  { %v284_v44 = vpop.f32.mrf.mxu2 }
 0x1c1   :  { %v285_v45 = vadd.f32 %v425_v43, %v284_v44 }
 0x1c3   :  { %v289_v46 = vmax.f32 %v285_v45, 0.0 }
 0x1c5   :  { %291 = vst [vmem:[%s502_s3] sm:$0xff] %v289_v46 }
 0x1c8   :  { %v286_v47 = vpop.f32.mrf.mxu2 }
 0x1c9   :  { %v287_v48 = vadd.f32 %v425_v43, %v286_v47 }
 0x1cb   :  { %v290_v49 = vmax.f32 %v287_v48, 0.0 }
 0x1cd   :  { %292 = vst [vmem:[%s502_s3 + $0x8] sm:$0xff] %v290_v49 }
 0x1ce   :  { %297 = vsyncpa [#allocation3], 1 }

</bundles_post_ra>
